<compile_context>
chip_gen: v6e
topology: v6e:2x2x1
jax: 0.10.0
libtpu: 0.0.40
codegen_flags: <defaults>
</compile_context>

<pallas_src>
import math

import jax
import jax.numpy as jnp
from jax.experimental import pallas as pl
from jax.experimental.pallas import tpu as pltpu

# ----- small, module-consistent sizes (stand-ins for features=256, out_c=512) -----
FEATURES = 32       # `features`  (head1 in-channels)
OUT_C = 64          # `self.out_c` (CLIP embedding dim)
NUM_LAB = 2         # per-image labels: ['others', class_name]
NUM_CLASSES = 4     # size of the label list / text table
# self.logit_scale = nn.Parameter(ones([]) * np.log(1/0.07)).exp()
LOGIT_SCALE = float(math.exp(math.log(1.0 / 0.07)))


def _lseg_head_kernel(x_ref, w_ref, b_ref, t_ref, o_ref):
    """Fused head1 (1x1 conv) + image L2-normalize + logit matmul.

    x_ref: (FEATURES, TM)     channels-major pixel block of path_1 (bf16)
    w_ref: (FEATURES, OUT_C)  head1 weight (PyTorch (out_c, feat, 1, 1) transposed, bf16)
    b_ref: (OUT_C, 1)         head1 bias (f32 column vector)
    t_ref: (NUM_LAB, OUT_C)   text features, pre-normalized & pre-scaled, bf16
    o_ref: (NUM_LAB, TM)      lane-dense per-pixel class logits (f32)
    """
    # scratch.head1: 1x1 conv == contraction over channels (MXU, bf16 in / f32 acc);
    # contracting FEATURES of W against FEATURES of x avoids any NHWC transpose.
    # TODO(synk): bf16 staging differs slightly from PyTorch's f32 conv accumulation.
    feat = jax.lax.dot_general(
        w_ref[...], x_ref[...],
        dimension_numbers=(((0,), (0,)), ((), ())),
        preferred_element_type=jnp.float32,
    ) + b_ref[...]                                            # (OUT_C, TM)
    # image_feature / image_feature.norm(dim=-1): embedding axis is axis 0 here.
    # eps guards the (PyTorch-would-also-NaN) all-zero-row case.
    inv_norm = jax.lax.rsqrt(jnp.sum(feat * feat, axis=0, keepdims=True) + 1e-12)
    feat = feat * inv_norm
    # logit_scale * image_feature.half() @ text_feature.t(), computed transposed
    # so the result (NUM_LAB, TM) is lane-dense (unmasked vst).
    # TODO(synk): PyTorch casts to fp16; bf16 is used here for the TPU MXU.
    o_ref[...] = jnp.dot(
        t_ref[...], feat.astype(jnp.bfloat16),
        preferred_element_type=jnp.float32,
    )


def _tpu_config():
    """Generation-aware (vmem_budget, vmem_limit, min_grid)."""
    kind = ""
    try:
        kind = jax.devices()[0].device_kind.lower()
    except Exception:  # pragma: no cover - defensive; fall through to defaults
        pass
    if "v7" in kind:
        # 64 MiB VMEM per TC, 2 TCs/chip: leave headroom, keep both cores fed.
        return 40 << 20, 48 << 20, 4
    if "v5" in kind or "v6" in kind:
        # 128 MiB VMEM, single TC: grid is a serial loop, 2 steps suffice to pipeline.
        return 64 << 20, 96 << 20, 2
    # Unknown generation: conservative, v7x-safe defaults.
    return 32 << 20, 48 << 20, 4


def _pick_tm(hw, n, *, vmem_budget, min_grid, cap=32768):
    """Largest lane-aligned pixel tile within the VMEM budget (the kernel is
    grid-step-overhead / HBM-read bound, so bigger is better), clamped so the
    parallel grid keeps >= min_grid steps (feeds both v7x TensorCores)."""
    def per_step_bytes(tm):
        return (2 * FEATURES * tm * 2        # double-buffered bf16 input blocks
                + 2 * NUM_LAB * tm * 4       # double-buffered f32 output blocks
                + FEATURES * OUT_C * 2       # resident head1 weight (bf16)
                + OUT_C * 4                  # bias
                + NUM_LAB * OUT_C * 2        # text features (bf16)
                + OUT_C * tm * (4 + 2))      # feat intermediate (f32 + bf16)

    hw_pad = pl.cdiv(hw, 128) * 128          # wrapper pads; tail is sliced off
    limit = min(cap, hw_pad)
    tm = 128
    while tm + 128 <= limit and per_step_bytes(tm + 128) <= vmem_budget:
        tm += 128
    tm = min(tm, hw_pad)
    # Keep enough total grid steps that no TensorCore idles (matters when N is
    # small and tm would otherwise swallow the whole image).
    while tm > 128 and n * pl.cdiv(hw_pad, tm) < min_grid:
        tm = pl.cdiv(max(128, tm // 2), 128) * 128
    return tm


def lseg_logits(path1_nchw, text_scaled, head1_w, head1_b):
    """path1_nchw: (N, FEATURES, H, W) f32.
    text_scaled:  (N, NUM_LAB, OUT_C) bf16, already L2-normalized * logit_scale.
    head1_w: (FEATURES, OUT_C) f32; head1_b: (OUT_C, 1) f32.
    Returns logits (N, NUM_LAB, H, W) f32."""
    n, c, h, w = path1_nchw.shape
    hw = h * w
    # Channels-major (no HBM transpose); bf16 halves the dominant HBM read.
    x = path1_nchw.reshape(n, c, hw).astype(jnp.bfloat16)
    w_bf = head1_w.astype(jnp.bfloat16)          # cast once per call, not per tile

    vmem_budget, vmem_limit, min_grid = _tpu_config()
    tm = _pick_tm(hw, n, vmem_budget=vmem_budget, min_grid=min_grid)
    n_blk = pl.cdiv(hw, tm)
    hw_pad = n_blk * tm
    if hw_pad != hw:
        # No divisor constraint on tm: zero-pad the pixel axis, slice tail off below.
        x = jnp.pad(x, ((0, 0), (0, 0), (0, hw_pad - hw)))

    out = pl.pallas_call(
        _lseg_head_kernel,
        out_shape=jax.ShapeDtypeStruct((n, NUM_LAB, hw_pad), jnp.float32),
        grid=(n, n_blk),
        in_specs=[
            pl.BlockSpec((None, c, tm), lambda i, m: (i, 0, m)),            # x block
            pl.BlockSpec((c, OUT_C), lambda i, m: (0, 0)),                  # head1 W
            pl.BlockSpec((OUT_C, 1), lambda i, m: (0, 0)),                  # head1 b
            pl.BlockSpec((None, NUM_LAB, OUT_C), lambda i, m: (i, 0, 0)),   # text feats
        ],
        out_specs=pl.BlockSpec((None, NUM_LAB, tm), lambda i, m: (i, 0, m)),
        compiler_params=pltpu.CompilerParams(
            dimension_semantics=("parallel", "parallel"),
            vmem_limit_bytes=vmem_limit),
    )(x, w_bf, head1_b, text_scaled)

    if hw_pad != hw:
        out = out[:, :, :hw]
    # (N, NUM_LAB, HW) -> (N, NUM_LAB, H, W): free reshape, no permute.
    return out.reshape(n, NUM_LAB, h, w)


def _interp_matrix(n_in, n_out):
    """Dense 1-D bilinear interpolation matrix (n_out, n_in), align_corners=True."""
    if n_in == 1:
        return jnp.ones((n_out, 1), jnp.float32)
    s = jnp.arange(n_out, dtype=jnp.float32) * (n_in - 1) / (n_out - 1)
    lo = jnp.minimum(jnp.floor(s).astype(jnp.int32), n_in - 2)
    frac = s - lo.astype(jnp.float32)
    rows = jnp.arange(n_out)
    m = jnp.zeros((n_out, n_in), jnp.float32)
    m = m.at[rows, lo].add(1.0 - frac)
    m = m.at[rows, lo + 1].add(frac)
    return m


def bilinear_up2_align_corners(x):
    """scratch.output_conv == Interpolate(scale_factor=2, bilinear, align_corners=True).
    Expressed as two small interpolation-matrix matmuls (MXU path) instead of
    gather+lerp: gathers lower poorly on TPU and cost extra HBM round trips.
    x: (N, C, H, W) -> (N, C, 2H, 2W).
    TODO(synk): could be fused into the kernel epilogue (logits are only
                NUM_LAB channels) to save one HBM pass; kept as glue here."""
    _, _, h, w = x.shape
    uh = _interp_matrix(h, 2 * h)                    # (2H, H)
    uw = _interp_matrix(w, 2 * w)                    # (2W, W)
    y = jnp.einsum('oh,nchw->ncow', uh, x)           # rows
    y = jnp.einsum('pw,ncow->ncop', uw, y)           # cols
    return y


def lseg_forward(x, class_info, params):
    """LSeg.forward from path_1 onward (backbone is a stand-in, see TODOs)."""
    # encode_text stand-in; text L2-norm, logit_scale and bf16 cast are hoisted
    # out of the per-tile kernel loop (done once per call).
    t = params["text_table"][class_info]                       # (N, NUM_LAB, OUT_C)
    t = t * jax.lax.rsqrt(jnp.sum(t * t, axis=-1, keepdims=True) + 1e-12)
    t_scaled = (LOGIT_SCALE * t).astype(jnp.bfloat16)
    logits = lseg_logits(x, t_scaled, params["head1_w"], params["head1_b"])
    return bilinear_up2_align_corners(logits)                  # output_conv


def init_params(key):
    k1, k2, k3 = jax.random.split(key, 3)
    # PyTorch head1 weight (OUT_C, FEATURES, 1, 1) stored transposed as (FEATURES, OUT_C)
    head1_w = (jax.random.normal(k1, (FEATURES, OUT_C), jnp.float32)
               / math.sqrt(FEATURES))
    # bias stored as a column vector so it broadcasts over the pixel (lane) axis
    head1_b = jax.random.normal(k2, (OUT_C, 1), jnp.float32) * 0.01
    # deterministic stand-in for encode_text(['others', class_i]) per class
    text_table = jax.random.normal(k3, (NUM_CLASSES, NUM_LAB, OUT_C), jnp.float32)
    return {"head1_w": head1_w, "head1_b": head1_b, "text_table": text_table}


if __name__ == "__main__":
    key = jax.random.PRNGKey(0)
    kp, kx = jax.random.split(key)
    params = init_params(kp)

    N, H, W = 2, 16, 16
    # x stands in for path_1 (refinenet1 output), NCHW: (N, features, H, W)
    x = jax.random.normal(kx, (N, FEATURES, H, W), jnp.float32)
    class_info = jnp.array([0, 2], dtype=jnp.int32)

    out = jax.jit(lseg_forward)(x, class_info, params)
    out = jax.block_until_ready(out)

    assert out.shape == (N, NUM_LAB, 2 * H, 2 * W), out.shape
    assert out.dtype == jnp.float32
    assert bool(jnp.all(jnp.isfinite(out)))
    print("KERNEL_OK")
</pallas_src>

<mosaic_0001>
module attributes {stable_mosaic.version = 11 : i64} {
  func.func private @main(%arg0: i32) attributes {dimension_semantics = [#tpu.dimension_semantics<core_parallel>], iteration_bounds = array<i64: 2>, tpu.core_type = #tpu.core_type<sc_scalar_subcore>, window_params = []} {
    return
  }
}

module attributes {stable_mosaic.version = 11 : i64} {
  func.func private @main(%arg0: i32) attributes {dimension_semantics = [#tpu.dimension_semantics<core_parallel>], iteration_bounds = array<i64: 2>, tpu.core_type = #tpu.core_type<sc_scalar_subcore>, window_params = []} {
    return
  }
}

module attributes {stable_mosaic.version = 11 : i64} {
  func.func @_lseg_head_kernel(%arg0: i32, %arg1: i32, %arg2: memref<1x32x128xbf16, #tpu.memory_space<vmem>>, %arg3: memref<32x64xbf16, #tpu.memory_space<vmem>>, %arg4: memref<64x1xf32, #tpu.memory_space<vmem>>, %arg5: memref<1x2x64xbf16, #tpu.memory_space<vmem>>, %arg6: memref<1x2x128xf32, #tpu.memory_space<vmem>>) attributes {dimension_semantics = [#tpu.dimension_semantics<parallel>, #tpu.dimension_semantics<parallel>], iteration_bounds = array<i64: 2, 2>, scalar_prefetch = 0 : i64, scratch_operands = 0 : i64, tpu.core_type = #tpu.core_type<tc>, window_params = [{transform_indices = @transform_0, window_bounds = array<i64: 1, 32, 128>}, {pipeline_mode = #tpu.pipeline_mode<synchronous>, transform_indices = @transform_1, window_bounds = array<i64: 32, 64>}, {pipeline_mode = #tpu.pipeline_mode<synchronous>, transform_indices = @transform_2, window_bounds = array<i64: 64, 1>}, {transform_indices = @transform_3, window_bounds = array<i64: 1, 2, 64>}, {transform_indices = @transform_4, window_bounds = array<i64: 1, 2, 128>}]} {
    %c0 = arith.constant 0 : index
    %c0_0 = arith.constant 0 : index
    %0 = vector.load %arg3[%c0, %c0_0] : memref<32x64xbf16, #tpu.memory_space<vmem>>, vector<32x64xbf16>
    %c0_1 = arith.constant 0 : index
    %c0_2 = arith.constant 0 : index
    %c0_3 = arith.constant 0 : index
    %1 = vector.load %arg2[%c0_1, %c0_2, %c0_3] : memref<1x32x128xbf16, #tpu.memory_space<vmem>>, vector<1x32x128xbf16>
    %2 = vector.shape_cast %1 : vector<1x32x128xbf16> to vector<32x128xbf16>
    %cst = arith.constant dense<0.000000e+00> : vector<64x128xf32>
    %3 = tpu.matmul %0, %2, %cst {dimension_numbers = #tpu.dot_dimension_numbers<[0], [0], [1], [1], [0, 1, 1, 1], [], []>} : vector<32x64xbf16>, vector<32x128xbf16>, vector<64x128xf32> -> vector<64x128xf32>
    %c0_4 = arith.constant 0 : index
    %c0_5 = arith.constant 0 : index
    %4 = vector.load %arg4[%c0_4, %c0_5] : memref<64x1xf32, #tpu.memory_space<vmem>>, vector<64x1xf32>
    %5 = vector.broadcast %4 : vector<64x1xf32> to vector<64x128xf32>
    %6 = arith.addf %3, %5 : vector<64x128xf32>
    %7 = arith.mulf %6, %6 : vector<64x128xf32>
    %cst_6 = arith.constant dense<0.000000e+00> : vector<128xf32>
    %8 = vector.multi_reduction <add>, %7, %cst_6 [0] : vector<64x128xf32> to vector<128xf32>
    %9 = vector.shape_cast %8 : vector<128xf32> to vector<1x128xf32>
    %cst_7 = arith.constant 9.99999996E-13 : f32
    %10 = vector.broadcast %cst_7 : f32 to vector<1x128xf32>
    %11 = arith.addf %9, %10 : vector<1x128xf32>
    %12 = math.rsqrt %11 : vector<1x128xf32>
    %13 = vector.broadcast %12 : vector<1x128xf32> to vector<64x128xf32>
    %14 = arith.mulf %6, %13 : vector<64x128xf32>
    %c0_8 = arith.constant 0 : index
    %c0_9 = arith.constant 0 : index
    %c0_10 = arith.constant 0 : index
    %15 = vector.load %arg5[%c0_8, %c0_9, %c0_10] : memref<1x2x64xbf16, #tpu.memory_space<vmem>>, vector<1x2x64xbf16>
    %16 = vector.shape_cast %15 : vector<1x2x64xbf16> to vector<2x64xbf16>
    %17 = arith.truncf %14 : vector<64x128xf32> to vector<64x128xbf16>
    %cst_11 = arith.constant dense<0.000000e+00> : vector<2x128xf32>
    %18 = tpu.matmul %16, %17, %cst_11 {dimension_numbers = #tpu.dot_dimension_numbers<[1], [0], [0], [1], [0, 0, 1, 1], [], []>} : vector<2x64xbf16>, vector<64x128xbf16>, vector<2x128xf32> -> vector<2x128xf32>
    %c0_12 = arith.constant 0 : index
    %c0_13 = arith.constant 0 : index
    %c0_14 = arith.constant 0 : index
    %19 = vector.load %arg6[%c0_12, %c0_13, %c0_14] : memref<1x2x128xf32, #tpu.memory_space<vmem>>, vector<1x2x128xf32>
    %20 = vector.shape_cast %19 : vector<1x2x128xf32> to vector<2x128xf32>
    %21 = vector.shape_cast %18 : vector<2x128xf32> to vector<1x2x128xf32>
    tpu.vector_store %arg6[%c0_12, %c0_13, %c0_14], %21 {strides = array<i32>} : memref<1x2x128xf32, #tpu.memory_space<vmem>>, vector<1x2x128xf32>,
    return
  }
  func.func @transform_0(%arg0: i32, %arg1: i32) -> (i32, i32, i32) {
    %c0_i32 = arith.constant 0 : i32
    %c0_i32_0 = arith.constant 0 : i32
    return %arg0, %c0_i32, %arg1 : i32, i32, i32
  }
  func.func @transform_1(%arg0: i32, %arg1: i32) -> (i32, i32) {
    %c0_i32 = arith.constant 0 : i32
    %c0_i32_0 = arith.constant 0 : i32
    %c0_i32_1 = arith.constant 0 : i32
    return %c0_i32, %c0_i32_0 : i32, i32
  }
  func.func @transform_2(%arg0: i32, %arg1: i32) -> (i32, i32) {
    %c0_i32 = arith.constant 0 : i32
    %c0_i32_0 = arith.constant 0 : i32
    %c0_i32_1 = arith.constant 0 : i32
    return %c0_i32, %c0_i32_0 : i32, i32
  }
  func.func @transform_3(%arg0: i32, %arg1: i32) -> (i32, i32, i32) {
    %c0_i32 = arith.constant 0 : i32
    %c0_i32_0 = arith.constant 0 : i32
    %c0_i32_1 = arith.constant 0 : i32
    return %arg0, %c0_i32, %c0_i32_0 : i32, i32, i32
  }
  func.func @transform_4(%arg0: i32, %arg1: i32) -> (i32, i32, i32) {
    %c0_i32 = arith.constant 0 : i32
    %c0_i32_0 = arith.constant 0 : i32
    return %arg0, %c0_i32, %arg1 : i32, i32, i32
  }
}

</mosaic_0001>

<bundles_post_ra>
// kernel: lseg_forward.1
= control target key start
LH: loop header
LB: loop body
LE: loop exit
PB: predicated region body
PF: predicated region fallthrough
CT: control target
= control target key end

     0   :  { %s852_s15 = smov 0   ;;  %s854_s16 = smov 0   ;;  %s981_s0 = inlined_call_operand.vmem [shape: bf16[2,32,256], index: 0, kind: input, shape index: {}]   ;;  %s982_s1 = inlined_call_operand.vmem [shape: bf16[32,64], index: 1, kind: input, shape index: {}]   ;;  %s983_s2 = inlined_call_operand.vmem [shape: f32[64,1], index: 2, kind: input, shape index: {}]   ;;  %s984_s3 = inlined_call_operand.vmem [shape: bf16[2,2,64], index: 3, kind: input, shape index: {}]   ;;  %s985_s4 = inlined_call_operand.vmem [shape: f32[2,2,256], index: 4, kind: output, shape index: {}]  }
   0x1   :  { %s856_s17 = smov 0   ;;  %s858_s18 = smov 0  }
   0x2   :  { %s860_s19 = smov 0   ;;  %s862_s20 = smov 0  }
   0x3   :  { %s864_s21 = smov 0  }
   0x4 LB: > { %s23_s22 = sadd.s32 1, %s814_s19  ;;  %s26_s23 = sadd.s32 1, %s818_s20  ;;  %s822_s21 = sphi %s864_s21, %s14_s21   ;;  %s818_s20 = sphi %s862_s20, %s991_s20   ;;  %s814_s19 = sphi %s860_s19, %s990_s19   ;;  %s810_s18 = sphi %s858_s18, %s989_s18   ;;  %s806_s17 = sphi %s856_s17, %s988_s17   ;;  %s802_s16 = sphi %s854_s16, %s987_s16   ;;  %s798_s15 = sphi %s852_s15, %s986_s15  }
   0x5   : > { %p24_p0 = scmp.ge.s32.totalorder %s23_s22, 2  ;;  %p42_p1 = scmp.ne.s32.totalorder %s802_s16, %s798_s15 }
   0x6   : > { %p43_p2 = scmp.eq.s32.totalorder %s822_s21, 0  ;;  %s35_s27 = sadd.s32 1, %s802_s16 }
   0x7   : > { %s993_s22 = smov (%p24_p0, %s23_s22), 0  ;;  %s995_s23 = smov (!%p24_p0, %s26_s23), %s818_s20 }
   0x8   : > { %p44_p3 = por %p43_p2, %p42_p1  ;;  %p28_p4 = scmp.ge.s32.totalorder %s995_s23, 2 }
   0x9   : > { %s31_s24 = ssub.s32 %s814_s19, %s993_s22  ;;  %p647_p6 = scmp.ge.s32.totalorder %s822_s21, 4 }
   0xa   : > { %s997_s23 = smov (%p28_p4, %s995_s23), 0 }
   0xb   : > { %s30_s25 = ssub.s32 %s818_s20, %s997_s23  ;;  %170 = sbr.rel (%p647_p6) target bundleno = 24 (0x18), region = 24 }
   0xc   : > { %s32_s26 = sor.u32 %s31_s24, %s30_s25 }
   0xd   : > { %p33_p5 = scmp.eq.s32.totalorder %s32_s26, 0 }
   0xf   : > { %s903_s28 = scalar_select %p33_p5, %s802_s16, %s35_s27  }
  0x10   : > { %173 = sbr.rel (!%p44_p3) target bundleno = 24 (0x18), region = 28  ;;  %s175_s29 = sand.u32 (%p44_p3), 1, %s802_s16  }
  0x11   : > { %s649_s30 = sshll.u32 (%p44_p3), %s818_s20, 3  ;;  %s648_s5 = sshll.u32 (%p44_p3), %s175_s29, 4 }
  0x12   : > { %s179_s6 = sadd.s32 (%p44_p3), %s814_s19, %s649_s30  ;;  %s177_s11 = scalar_lea.vmem (%p44_p3), [#allocation2], %s648_s5 }
  0x13   : > { %s650_s7 = sshll.u32 (%p44_p3), %s179_s6, 2 }
  0x14   : > { %s181_s10 = scalar_lea.vmem (%p44_p3), %s981_s0, %s650_s7 }
  0x15   : > { %v198_v0 = vld [vmem:[%s181_s10] sm:$0xf]  ;;  %v200_v1 = vld [vmem:[%s181_s10 + $0x8] sm:$0xf]  ;;  %v202_v2 = vld [vmem:[%s181_s10 + $0x10] sm:$0xf] }
  0x16   : > { %199 = vst [vmem:[%s177_s11] sm:$0xf] %v198_v0  ;;  %201 = vst [vmem:[%s177_s11 + $0x4] sm:$0xf] %v200_v1  ;;  %v204_v3 = vld [vmem:[%s181_s10 + $0x18] sm:$0xf] }
  0x17   : > { %203 = vst [vmem:[%s177_s11 + $0x8] sm:$0xf] %v202_v2  ;;  %205 = vst [vmem:[%s177_s11 + $0xc] sm:$0xf] %v204_v3 }
  0x18 PF: > { %p651_p7 = scmp.ge.s32.totalorder %s822_s21, 1  ;;  %p242_p8 = scmp.lt.s32.totalorder %s822_s21, 5 }
  0x1a   : > { %p243_p9 = pnand %p651_p7, %p242_p8 }
  0x1b   : > { %s249_s14 = sand.u32 (!%p243_p9), 1, %s798_s15   ;;  %p280_p10 = scmp.lt.s32.totalorder (!%p243_p9), %s810_s18, 1 }
  0x1c   : > { %246 = sbr.rel (%p243_p9) target bundleno = 600 (0x258), region = 73  ;;  %s652_s24 = sshll.u32 (!%p243_p9), %s249_s14, 4 }
  0x1d   : > { %s251_s30 = scalar_lea.vmem (!%p243_p9), [#allocation2], %s652_s24  ;;  %p285_p11 = scmp.lt.s32.totalorder (!%p243_p9), %s806_s17, 1 }
  0x21   : > { %v762_v4 = vld [vmem:[%s982_s1] sm:$0xff]   ;;  %v763_v5 = vld [vmem:[%s982_s1 + $0x8] sm:$0xff]   ;;  %v824_v8 = vmov 0   ;;  %v303_v11 = vld [vmem:[%s983_s2 + $0x18] sm:$0xff]  ;;  %vm388_vm0 = vcmask 261120   ;;  %v825_v21 = vmov 0.0  }
  0x22   : > { %360 = vxpose.xlu0.c.b16.start [1/2] (short) (narrow) %v762_v4, 64  ;;  %v300_v6 = vld [vmem:[%s983_s2] sm:$0xff]  ;;  %760 = vset.pattern.permute.xlu1 %v824_v8  ;;  %v765_v9 = vld [vmem:[%s251_s30] sm:$0xff]   ;;  %v302_v14 = vld [vmem:[%s983_s2 + $0x10] sm:$0xff]  ;;  %vm826_vm1 = vmmov 0   ;;  %s999_s18 = smov (!%p280_p10, %s810_s18), 1 }
  0x23   : > { %v764_v7 = vld [vmem:[%s251_s30 + $0x8] sm:$0xff]   ;;  %310 = vperm.xlu1 %760, %v300_v6   ;;  %v301_v10 = vld [vmem:[%s983_s2 + $0x8] sm:$0xff]  ;;  %v307_v16 = vld [vmem:[%s983_s2 + $0x38] sm:$0xff]  ;;  %689 = vmatprep.subr.bf16.mxu1 %v825_v21  ;;  %s282_s30 = scalar_lea.vmem %s984_s3, %s999_s18  ;;  %vm502_vm2 = vcmask 523264   ;;  %s1001_s17 = smov (!%p285_p11, %s806_s17), 1 }
  0x24   : > { %677 = vmatprep.subr.bf16.mxu0 %v764_v7  ;;  %v304_v12 = vld [vmem:[%s983_s2 + $0x20] sm:$0xff]  ;;  %v305_v13 = vld [vmem:[%s983_s2 + $0x28] sm:$0xff]  ;;  %v306_v15 = vld [vmem:[%s983_s2 + $0x30] sm:$0xff]  ;;  %697 = vmatprep.mubr.msk.bf16.mxu1 %vm826_vm1, %v825_v21  ;;  %s653_s5 = sshll.u32 %s999_s18, 1 }
  0x25   : > { %678 = vmatpush3.bf16.msra.mxu0 %v764_v7  ;;  %s288_s6 = sadd.s32 %s653_s5, %s1001_s17 }
  0x26   : > { %361 = vxpose.xlu0.c.b16.end [2/2] (short) (narrow) %v763_v5, 64  ;;  %679 = vmatprep.subr.bf16.mxu0 %v765_v9  ;;  %s654_s15 = sshll.u32 %s288_s6, 1 }
  0x27   : > { %315 = vperm.xlu1 %760, %v301_v10   ;;  %s290_s9 = scalar_lea.vmem %s985_s4, %s654_s15 }
  0x29   : > { %680 = vmatpush3.bf16.msra.mxu0 %v765_v9 }
  0x2b   : > { %325 = vperm.xlu1 %760, %v303_v11  }
  0x2f   : > { %761 = vset.pattern.permute.xlu0 %v824_v8  ;;  %330 = vperm.xlu1 %760, %v304_v12  }
  0x33   : > { %335 = vperm.xlu1 %760, %v305_v13  }
  0x37   : > { %320 = vperm.xlu0 %761, %v302_v14   ;;  %340 = vperm.xlu1 %760, %v306_v15  }
  0x3b   : > { %345 = vperm.xlu1 %760, %v307_v16  }
  0x84   : > { %v368_v17 = vpop.trf.xlu0 }
  0x85   : > { %681 = vmatprep.mubr.msk.bf16.mxu0 %vm388_vm0, %v368_v17  ;;  %v497_v17 = vld [vmem:[%s282_s30] sm:$0x1] }
  0x88   : > { %v369_v18 = vpop.trf.xlu0 }
  0x89   : > { %682 = vmatmul.mubr.msk.bf16.vlgmr.msra.gmra.mxu0 %vm388_vm0, %v369_v18 }
  0x8c   : > { %v370_v19 = vpop.trf.xlu0 }
  0x8d   : > { %685 = vmatprep.mubr.msk.bf16.mxu0 %vm388_vm0, %v370_v19 }
  0x90   : > { %v371_v20 = vpop.trf.xlu0 }
  0x91   : > { %686 = vmatmul.mubr.msk.bf16.gmra.mxu0 %vm388_vm0, %v371_v20 }
  0x9e   : > { %v311_v22 = vpop.permute.xlu1 %310 }
  0xa2   : > { %v316_v23 = vpop.permute.xlu1 %315 }
  0xa6   : > { %v326_v24 = vpop.permute.xlu1 %325 }
  0xaa   : > { %v331_v25 = vpop.permute.xlu1 %330 }
  0xae   : > { %v336_v28 = vpop.permute.xlu1 %335 }
  0xb2   : > { %v321_v29 = vpop.permute.xlu0 %320  ;;  %v341_v39 = vpop.permute.xlu1 %340 }
  0xb6   : > { %v346_v52 = vpop.permute.xlu1 %345 }
 0x149   : > { %v683_v26 = vpop.f32.mrf.mxu0 }
 0x14a   : > { %v444_v33 = vadd.f32 %v683_v26, %v321_v29 }
 0x14b   : > { %v435_v27 = vpop.f32.mrf.mxu0 }
 0x14c   : > { %v436_v31 = vadd.f32 %v435_v27, %v311_v22  ;;  %v468_v41 = vmul.f32 %v444_v33, %v444_v33 }
 0x14d   : > { %v684_v30 = vpop.f32.mrf.mxu0 }
 0x14e   : > { %v466_v36 = vmul.f32 %v436_v31, %v436_v31  ;;  %v447_v37 = vadd.f32 %v684_v30, %v326_v24 }
 0x14f   : > { %v438_v32 = vpop.f32.mrf.mxu0 }
 0x150   : > { %v439_v34 = vadd.f32 %v438_v32, %v316_v23  ;;  %v469_v45 = vmul.f32 %v447_v37, %v447_v37 }
 0x151   : > { %v687_v35 = vpop.f32.mrf.mxu0 }
 0x152   : > { %v467_v38 = vmul.f32 %v439_v34, %v439_v34  ;;  %v460_v48 = vadd.f32 %v687_v35, %v341_v39 }
 0x153   : > { %v451_v40 = vpop.f32.mrf.mxu0 }
 0x154   : > { %v474_v42 = vadd.f32 %v467_v38, %v466_v36  ;;  %v452_v43 = vadd.f32 %v451_v40, %v331_v25  ;;  %v472_v56 = vmul.f32 %v460_v48, %v460_v48 }
 0x155   : > { %v688_v44 = vpop.f32.mrf.mxu0 }
 0x156   : > { %v475_v46 = vadd.f32 %v474_v42, %v468_v41  ;;  %v470_v49 = vmul.f32 %v452_v43, %v452_v43  ;;  %v463_v54 = vadd.f32 %v688_v44, %v346_v52 }
 0x157   : > { %v454_v47 = vpop.f32.mrf.mxu0 }
 0x158   : > { %v476_v50 = vadd.f32 %v475_v46, %v469_v45  ;;  %v455_v51 = vadd.f32 %v454_v47, %v336_v28  ;;  %v473_v58 = vmul.f32 %v463_v54, %v463_v54 }
 0x15a   : > { %v477_v53 = vadd.f32 %v476_v50, %v470_v49  ;;  %v471_v55 = vmul.f32 %v455_v51, %v455_v51 }
 0x15c   : > { %v478_v57 = vadd.f32 %v477_v53, %v471_v55 }
 0x15e   : > { %v479_v59 = vadd.f32 %v478_v57, %v472_v56 }
 0x160   : > { %v480_v60 = vadd.f32 %v479_v59, %v473_v58 }
 0x162   : > { %v481_v61 = vrot.slane %v480_v60, 4 }
 0x164   : > { %v482_v62 = vadd.f32 %v481_v61, %v480_v60 }
 0x166   : > { %v483_v63 = vrot.slane %v482_v62, 2 }
 0x168   : > { %v484_v0 = vadd.f32 %v483_v63, %v482_v62 }
 0x16a   : > { %v485_v1 = vrot.slane %v484_v0, 1 }
 0x16c   : > { %v486_v2 = vadd.f32 %v485_v1, %v484_v0 }
 0x16e   : > { %v487_v3 = vadd.f32 1e-12, %v486_v2 }
 0x170   : > { %766 = vrsqrt.f32 %v487_v3 }
 0x17d   : > { %v767_v4 = vpop.eup %766 }
 0x17e   : > { %v495_v5 = vmul.f32 %v767_v4, %v460_v48  ;;  %v496_v6 = vmul.f32 %v767_v4, %v463_v54  ;;  %v494_v7 = vmul.f32 %v767_v4, %v455_v51  ;;  %v493_v9 = vmul.f32 %v767_v4, %v452_v43 }
 0x17f   : > { %v491_v11 = vmul.f32 %v767_v4, %v444_v33  ;;  %v492_v12 = vmul.f32 %v767_v4, %v447_v37  ;;  %v489_v14 = vmul.f32 %v767_v4, %v436_v31  ;;  %v490_v15 = vmul.f32 %v767_v4, %v439_v34 }
 0x180   : > { %v501_v8 = vpack.c.bf16 %v496_v6, %v495_v5  ;;  %v500_v10 = vpack.c.bf16 %v494_v7, %v493_v9 }
 0x181   : > { %v499_v13 = vpack.c.bf16 %v492_v12, %v491_v11  ;;  %v498_v16 = vpack.c.bf16 %v490_v15, %v489_v14 }
 0x182   : > { %690 = vmatpush3.bf16.msra.mxu1 %v501_v8 }
 0x183   : > { %691 = vmatprep.subr.bf16.mxu1 %v825_v21 }
 0x186   : > { %692 = vmatpush3.bf16.msra.mxu1 %v500_v10 }
 0x187   : > { %693 = vmatprep.subr.bf16.mxu1 %v825_v21 }
 0x18a   : > { %694 = vmatpush3.bf16.msra.mxu1 %v499_v13 }
 0x18b   : > { %695 = vmatprep.subr.bf16.mxu1 %v825_v21 }
 0x18e   : > { %696 = vmatpush3.bf16.msra.mxu1 %v498_v16 }
 0x191   : > { %698 = vmatmul.mubr.msk.bf16.vlgmr.msra.gmra.mxu1 %vm502_vm2, %v497_v17 }
 0x251   : > { %v540_v18 = vpop.f32.mrf.mxu1 }
 0x252   : > { %546 = vst [vmem:[%s290_s9] sm:$0x3] %v540_v18 }
 0x253   : > { %v699_v19 = vpop.f32.mrf.mxu1 }
 0x255   : > { %v543_v20 = vpop.f32.mrf.mxu1 }
 0x257   : > { %v700_v21 = vpop.f32.mrf.mxu1 }
 0x258 PF: > { %s14_s21 = sadd.s32 1, %s822_s21   ;;  %s986_s15 = smov %s802_s16 }
 0x259   : > { %p11_p12 = scmp.ge.s32.totalorder %s14_s21, 6   ;;  %s987_s16 = smov %s903_s28 }
 0x25a   : > { %s988_s17 = smov %s814_s19  ;;  %s989_s18 = smov %s818_s20 }
 0x25b   : > { %s990_s19 = smov %s993_s22  ;;  %s991_s20 = smov %s997_s23 }
 0x25c   :  { %13 = sbr.rel (!%p11_p12) target bundleno = 4 (0x4), region = 115 }

</bundles_post_ra>
